<compile_context>
chip_gen: v7x
topology: tpu7x:2x2x1
jax: 0.10.0
libtpu: 0.0.40
codegen_flags: <defaults>
</compile_context>

<pallas_src>
import functools
import math

import jax
import jax.numpy as jnp
from jax.experimental import pallas as pl
from jax.experimental.pallas import tpu as pltpu


def _round_up(x, m):
    return ((x + m - 1) // m) * m


def _sublanes(itemsize):
    return 8 if itemsize >= 4 else (16 if itemsize == 2 else 32)


def _patch_merging_kernel(x_ref, p_ref, wa_ref, wb_ref, o_ref):
    """One row tile: fused 2x2 gather + LayerNorm(4C) + Linear(4C -> 2C)."""
    # x_ref : (th, 2, Wo, 2C)  dim1 = h parity; last dim = [w even | w odd]*C,
    #         so half a = [x0 | x2] (h even) and half b = [x1 | x3] (h odd).
    # p_ref : (4, 2C) rows = [gamma_a, gamma_b, beta_a, beta_b] (permuted order)
    # wa/wb : (2C, Cp) reduction-weight halves (rows permuted, cols zero-padded)
    # o_ref : (th*Wo, Cp)
    th, _, wo, c2 = x_ref.shape
    m = th * wo
    inv_n = 1.0 / (2 * c2)                       # 1 / (4*C)

    blk = x_ref[...]
    # NOTE: this (th, Wo, 2C) -> (th*Wo, 2C) flatten relayouts when Wo is not a
    # sublane multiple, but it keeps the matmul 2-D (Mosaic-supported) and the
    # output stores fully sublane/lane dense.
    # TODO(synk): switch to a rank-3 lax.dot_general (lhs free dims th, Wo) and
    # a 3-D output block once Mosaic lowers >2-D dot operands.
    a = blk[:, 0, :, :].reshape(m, c2).astype(jnp.float32)   # [x0 | x2]
    b = blk[:, 1, :, :].reshape(m, c2).astype(jnp.float32)   # [x1 | x3]

    # LayerNorm statistics over the (virtual) 4C axis via per-half sums
    # (two-pass centered variance, f32 -- matches torch exactly).
    mean = (jnp.sum(a, axis=-1, keepdims=True)
            + jnp.sum(b, axis=-1, keepdims=True)) * inv_n
    ca = a - mean
    cb = b - mean
    var = (jnp.sum(ca * ca, axis=-1, keepdims=True)
           + jnp.sum(cb * cb, axis=-1, keepdims=True)) * inv_n
    inv = jax.lax.rsqrt(var + 1e-5)              # PyTorch LayerNorm default eps

    ga = p_ref[0:1, :].astype(jnp.float32)
    gb = p_ref[1:2, :].astype(jnp.float32)
    ba = p_ref[2:3, :].astype(jnp.float32)
    bb = p_ref[3:4, :].astype(jnp.float32)
    xa = ca * inv * ga + ba
    xb = cb * inv * gb + bb

    wa = wa_ref[...]
    wb = wb_ref[...]
    # xn_cat @ w == xa @ wa + xb @ wb  (exact split of the 4C contraction).
    acc = jnp.dot(xa.astype(wa.dtype), wa, preferred_element_type=jnp.float32)
    acc = acc + jnp.dot(xb.astype(wb.dtype), wb, preferred_element_type=jnp.float32)
    o_ref[...] = acc.astype(o_ref.dtype)


def _vmem_caps():
    """(scoped-VMEM hard cap, target M-rows per tile) for the running chip."""
    phys = 64 << 20                     # conservative default (v7x per-core VMEM)
    try:
        info = pltpu.get_tpu_info()
        phys = int(getattr(info, "vmem_capacity_bytes", phys))
    except Exception:
        pass
    # Never request the full physical VMEM (leave headroom for Mosaic internal
    # scratch and the pipeline bookkeeping) -- critical on 64 MiB v7x parts.
    hard_cap = max(32 << 20, min(phys * 3 // 4, phys - (16 << 20)))
    target_rows = 2048 if phys >= (96 << 20) else 512
    return hard_cap, target_rows


def _pick_row_tile(R, Wo, C2, C2p, in_itemsize, out_itemsize,
                   w_bytes_resident, vmem_budget, target_rows):
    """Pick th (rows of (R, 2, Wo, 2C) per grid step); th*Wo is the matmul M."""
    sub_out = _sublanes(out_itemsize)
    sub_in = _sublanes(in_itemsize)
    unit = sub_out // math.gcd(Wo, sub_out)   # keep th*Wo sublane aligned
    wo_pad = _round_up(Wo, sub_in)
    c2_pad = _round_up(C2, 128)
    cp_pad = _round_up(C2p, 128)

    def footprint(th):
        m = th * Wo
        x_blk = th * 2 * wo_pad * c2_pad * in_itemsize            # one in buffer
        o_blk = _round_up(m, sub_out) * cp_pad * out_itemsize     # one out buffer
        f32_tmp = m * (6 * c2_pad + 2 * cp_pad) * 4               # live f32 temps
        return 2 * x_blk + 2 * o_blk + w_bytes_resident + f32_tmp + (256 << 10)

    th = max(unit, (min(R, max(1, target_rows // max(1, Wo))) // unit) * unit)
    while th > unit and footprint(th) > vmem_budget:
        th -= unit
    th = min(th, R)

    # Prefer an even number of grid steps so both TensorCores of a v7x chip
    # get half the work (harmless on single-core v5e/v6e).
    n = -(-R // th)
    if n % 2 == 1 and R > unit:
        th2 = _round_up(-(-R // (n + 1)), unit)
        th2 = min(th2, th if th < R else ((R - 1) // unit) * unit)
        if th2 >= unit and (-(-R // th2)) % 2 == 0:
            th = th2
    return th, footprint(th)


@functools.partial(jax.jit, static_argnames=("H", "W"))
def patch_merging(x, gamma, beta, w, *, H, W):
    """x: (B, H*W, C) -> (B, ceil(H/2)*ceil(W/2), 2*C).  w: (4C, 2C) (pre-T)."""
    B, L, C = x.shape
    assert L == H * W, "input feature has wrong size"
    xs = x.reshape(B, H, W, C)

    if (H % 2 == 1) or (W % 2 == 1):
        # TODO(synk): fold the odd-size zero padding into the kernel's index
        # map to avoid this extra HBM copy (rare case in Swin).
        xs = jnp.pad(xs, ((0, 0), (0, H % 2), (0, W % 2), (0, 0)))
    Hp, Wp = H + H % 2, W + W % 2
    Ho, Wo = Hp // 2, Wp // 2

    C2 = 2 * C          # one half of the concatenated 4C features
    C2out = 2 * C       # reduction output width
    R = B * Ho

    # Free (contiguous) reshape: (B, Hp, Wp, C) == (B*Ho, 2, Wo, 2C); the 2x2
    # spatial gather is done by the pipeline DMA.
    xg = xs.reshape(R, 2, Wo, C2)

    # Kernel feature order is [x0, x2, x1, x3]; permute the tiny parameters
    # once on the host so the fused math equals LayerNorm([x0,x1,x2,x3]) @ w.
    def perm(p):
        return jnp.concatenate(
            [p[0:C], p[2 * C:3 * C], p[C:2 * C], p[3 * C:4 * C]], axis=0)

    gp, bp, wp = perm(gamma), perm(beta), perm(w)
    params = jnp.stack([gp[:C2], gp[C2:], bp[:C2], bp[C2:]], axis=0)   # (4, 2C)

    wa, wb = wp[:C2], wp[C2:]
    if x.dtype == jnp.bfloat16:
        # bf16 MXU path: halves weight HBM traffic and resident VMEM.
        wa, wb = wa.astype(jnp.bfloat16), wb.astype(jnp.bfloat16)

    # Lane-dense output: pad a narrow output width up to a full 128-lane tile
    # so stores are unmasked; the zero columns are sliced off after the call.
    C2p = 128 if C2out < 128 else C2out
    if C2p != C2out:
        wa = jnp.pad(wa, ((0, 0), (0, C2p - C2out)))
        wb = jnp.pad(wb, ((0, 0), (0, C2p - C2out)))

    in_itemsize = jnp.dtype(x.dtype).itemsize
    out_itemsize = in_itemsize
    w_itemsize = jnp.dtype(wa.dtype).itemsize

    # Grid-invariant operands stay single-buffered (no double-buffering of the
    # big weight halves across the grid).  Falls back to the default pipeline
    # if this BlockSpec option is unavailable.
    def _resident_spec(shape):
        idx_map = lambda i, _n=len(shape): (0,) * _n
        try:
            return pl.BlockSpec(shape, idx_map, pipeline_mode=pl.Buffered(1)), 1
        except Exception:
            return pl.BlockSpec(shape, idx_map), 2

    wa_spec, w_bufs = _resident_spec((C2, C2p))
    wb_spec, _ = _resident_spec((C2, C2p))
    p_spec, _ = _resident_spec((4, C2))

    w_bytes_resident = (w_bufs * 2 * _round_up(C2, 128) * _round_up(C2p, 128)
                        * w_itemsize)

    hard_cap, target_rows = _vmem_caps()
    th, fp = _pick_row_tile(R, Wo, C2, C2p, in_itemsize, out_itemsize,
                            w_bytes_resident, hard_cap - (8 << 20), target_rows)
    n_tiles = -(-R // th)

    # Always hand the compiler the real scoped-VMEM budget (v5e's default is
    # only 16 MiB), but never the full physical VMEM (v7x headroom).
    vmem_limit = int(min(hard_cap, max(32 << 20, fp + (8 << 20))))

    out = pl.pallas_call(
        _patch_merging_kernel,
        out_shape=jax.ShapeDtypeStruct((R * Wo, C2p), x.dtype),
        grid_spec=pltpu.PrefetchScalarGridSpec(
            num_scalar_prefetch=0,
            grid=(n_tiles,),
            in_specs=[
                pl.BlockSpec((th, 2, Wo, C2), lambda i: (i, 0, 0, 0)),
                p_spec,
                wa_spec,
                wb_spec,
            ],
            out_specs=pl.BlockSpec((th * Wo, C2p), lambda i: (i, 0)),
        ),
        compiler_params=pltpu.CompilerParams(
            dimension_semantics=("parallel",),
            vmem_limit_bytes=vmem_limit),
    )(xg, params, wa, wb)

    if C2p != C2out:
        out = out[:, :C2out]
    return out.reshape(B, Ho * Wo, C2out)


def _reference(x, gamma, beta, w, H, W):
    B, L, C = x.shape
    xs = x.reshape(B, H, W, C)
    if (H % 2 == 1) or (W % 2 == 1):
        xs = jnp.pad(xs, ((0, 0), (0, H % 2), (0, W % 2), (0, 0)))
    x0 = xs[:, 0::2, 0::2, :]
    x1 = xs[:, 1::2, 0::2, :]
    x2 = xs[:, 0::2, 1::2, :]
    x3 = xs[:, 1::2, 1::2, :]
    xc = jnp.concatenate([x0, x1, x2, x3], -1).reshape(B, -1, 4 * C)
    xc = xc.astype(jnp.float32)
    mean = jnp.mean(xc, axis=-1, keepdims=True)
    var = jnp.mean((xc - mean) ** 2, axis=-1, keepdims=True)
    xn = (xc - mean) * jax.lax.rsqrt(var + 1e-5) * gamma + beta
    return jnp.dot(xn, w.astype(jnp.float32),
                   precision=jax.lax.Precision.HIGHEST)


if __name__ == "__main__":
    # Small shapes consistent with the module: dim=32, B=2, H=W=8.
    dim = 32
    B, H, W = 2, 8, 8
    C4, C2 = 4 * dim, 2 * dim

    key = jax.random.PRNGKey(0)
    kx, kg, kb, kw = jax.random.split(key, 4)
    x = jax.random.normal(kx, (B, H * W, dim), dtype=jnp.float32)
    gamma = 1.0 + 0.1 * jax.random.normal(kg, (C4,), dtype=jnp.float32)
    beta = 0.1 * jax.random.normal(kb, (C4,), dtype=jnp.float32)
    # torch nn.Linear(4*dim, 2*dim, bias=False).weight is (2C, 4C); stored
    # pre-transposed as (4C, 2C) so the kernel computes x @ w.
    w = jax.random.normal(kw, (C4, C2), dtype=jnp.float32) * (1.0 / math.sqrt(C4))

    out = jax.block_until_ready(patch_merging(x, gamma, beta, w, H=H, W=W))
    ref = _reference(x, gamma, beta, w, H, W)
    assert out.shape == (B, (H // 2) * (W // 2), C2), out.shape
    err = float(jnp.max(jnp.abs(out - ref)))
    # Tolerance accommodates MXU f32 multi-pass matmul vs XLA HIGHEST precision;
    # real logic bugs (permutation / stats) give O(0.1+) errors.
    assert err < 1e-2, err

    # Odd spatial dims exercise the zero-padding path (7x7 -> padded to 8x8).
    Ho_, Wo_ = 7, 7
    x_odd = jax.random.normal(kx, (B, Ho_ * Wo_, dim), dtype=jnp.float32)
    out_odd = jax.block_until_ready(
        patch_merging(x_odd, gamma, beta, w, H=Ho_, W=Wo_))
    ref_odd = _reference(x_odd, gamma, beta, w, Ho_, Wo_)
    assert out_odd.shape == (B, ((Ho_ + 1) // 2) * ((Wo_ + 1) // 2), C2)
    err_odd = float(jnp.max(jnp.abs(out_odd - ref_odd)))
    assert err_odd < 1e-2, err_odd

    print("KERNEL_OK")
</pallas_src>

<mosaic_0001>
module attributes {stable_mosaic.version = 11 : i64} {
  func.func @_patch_merging_kernel(%arg0: i32, %arg1: memref<4x2x4x64xf32, #tpu.memory_space<vmem>>, %arg2: memref<4x64xf32, #tpu.memory_space<vmem>>, %arg3: memref<64x128xf32, #tpu.memory_space<vmem>>, %arg4: memref<64x128xf32, #tpu.memory_space<vmem>>, %arg5: memref<16x128xf32, #tpu.memory_space<vmem>>) attributes {dimension_semantics = [#tpu.dimension_semantics<parallel>], iteration_bounds = array<i64: 2>, scalar_prefetch = 0 : i64, scratch_operands = 0 : i64, tpu.core_type = #tpu.core_type<tc>, window_params = [{transform_indices = @transform_0, window_bounds = array<i64: 4, 2, 4, 64>}, {pipeline_mode = #tpu.pipeline_mode<synchronous>, transform_indices = @transform_1, window_bounds = array<i64: 4, 64>}, {pipeline_mode = #tpu.pipeline_mode<synchronous>, transform_indices = @transform_2, window_bounds = array<i64: 64, 128>}, {pipeline_mode = #tpu.pipeline_mode<synchronous>, transform_indices = @transform_3, window_bounds = array<i64: 64, 128>}, {transform_indices = @transform_4, window_bounds = array<i64: 16, 128>}]} {
    %c0 = arith.constant 0 : index
    %c0_0 = arith.constant 0 : index
    %c0_1 = arith.constant 0 : index
    %c0_2 = arith.constant 0 : index
    %0 = vector.load %arg1[%c0, %c0_0, %c0_1, %c0_2] : memref<4x2x4x64xf32, #tpu.memory_space<vmem>>, vector<4x2x4x64xf32>
    %1 = vector.extract_strided_slice %0 {offsets = [0, 0, 0, 0], sizes = [4, 1, 4, 64], strides = [1, 1, 1, 1]} : vector<4x2x4x64xf32> to vector<4x1x4x64xf32>
    %2 = vector.shape_cast %1 : vector<4x1x4x64xf32> to vector<4x4x64xf32>
    %3 = vector.shape_cast %2 : vector<4x4x64xf32> to vector<16x64xf32>
    %4 = vector.extract_strided_slice %0 {offsets = [0, 1, 0, 0], sizes = [4, 1, 4, 64], strides = [1, 1, 1, 1]} : vector<4x2x4x64xf32> to vector<4x1x4x64xf32>
    %5 = vector.shape_cast %4 : vector<4x1x4x64xf32> to vector<4x4x64xf32>
    %6 = vector.shape_cast %5 : vector<4x4x64xf32> to vector<16x64xf32>
    %cst = arith.constant dense<0.000000e+00> : vector<16xf32>
    %7 = vector.multi_reduction <add>, %3, %cst [1] : vector<16x64xf32> to vector<16xf32>
    %8 = vector.shape_cast %7 : vector<16xf32> to vector<16x1xf32>
    %cst_3 = arith.constant dense<0.000000e+00> : vector<16xf32>
    %9 = vector.multi_reduction <add>, %6, %cst_3 [1] : vector<16x64xf32> to vector<16xf32>
    %10 = vector.shape_cast %9 : vector<16xf32> to vector<16x1xf32>
    %11 = arith.addf %8, %10 : vector<16x1xf32>
    %cst_4 = arith.constant 7.812500e-03 : f32
    %12 = vector.broadcast %cst_4 : f32 to vector<16x1xf32>
    %13 = arith.mulf %11, %12 : vector<16x1xf32>
    %14 = vector.broadcast %13 : vector<16x1xf32> to vector<16x64xf32>
    %15 = arith.subf %3, %14 : vector<16x64xf32>
    %16 = vector.broadcast %13 : vector<16x1xf32> to vector<16x64xf32>
    %17 = arith.subf %6, %16 : vector<16x64xf32>
    %18 = arith.mulf %15, %15 : vector<16x64xf32>
    %cst_5 = arith.constant dense<0.000000e+00> : vector<16xf32>
    %19 = vector.multi_reduction <add>, %18, %cst_5 [1] : vector<16x64xf32> to vector<16xf32>
    %20 = vector.shape_cast %19 : vector<16xf32> to vector<16x1xf32>
    %21 = arith.mulf %17, %17 : vector<16x64xf32>
    %cst_6 = arith.constant dense<0.000000e+00> : vector<16xf32>
    %22 = vector.multi_reduction <add>, %21, %cst_6 [1] : vector<16x64xf32> to vector<16xf32>
    %23 = vector.shape_cast %22 : vector<16xf32> to vector<16x1xf32>
    %24 = arith.addf %20, %23 : vector<16x1xf32>
    %cst_7 = arith.constant 7.812500e-03 : f32
    %25 = vector.broadcast %cst_7 : f32 to vector<16x1xf32>
    %26 = arith.mulf %24, %25 : vector<16x1xf32>
    %cst_8 = arith.constant 9.99999974E-6 : f32
    %27 = vector.broadcast %cst_8 : f32 to vector<16x1xf32>
    %28 = arith.addf %26, %27 : vector<16x1xf32>
    %29 = math.rsqrt %28 : vector<16x1xf32>
    %c0_9 = arith.constant 0 : index
    %c0_10 = arith.constant 0 : index
    %30 = vector.load %arg2[%c0_9, %c0_10] : memref<4x64xf32, #tpu.memory_space<vmem>>, vector<1x64xf32>
    %c1 = arith.constant 1 : index
    %c0_11 = arith.constant 0 : index
    %31 = vector.load %arg2[%c1, %c0_11] : memref<4x64xf32, #tpu.memory_space<vmem>>, vector<1x64xf32>
    %c2 = arith.constant 2 : index
    %c0_12 = arith.constant 0 : index
    %32 = vector.load %arg2[%c2, %c0_12] : memref<4x64xf32, #tpu.memory_space<vmem>>, vector<1x64xf32>
    %c3 = arith.constant 3 : index
    %c0_13 = arith.constant 0 : index
    %33 = vector.load %arg2[%c3, %c0_13] : memref<4x64xf32, #tpu.memory_space<vmem>>, vector<1x64xf32>
    %34 = vector.broadcast %29 : vector<16x1xf32> to vector<16x64xf32>
    %35 = arith.mulf %15, %34 : vector<16x64xf32>
    %36 = vector.broadcast %30 : vector<1x64xf32> to vector<16x64xf32>
    %37 = arith.mulf %35, %36 : vector<16x64xf32>
    %38 = vector.broadcast %32 : vector<1x64xf32> to vector<16x64xf32>
    %39 = arith.addf %37, %38 : vector<16x64xf32>
    %40 = vector.broadcast %29 : vector<16x1xf32> to vector<16x64xf32>
    %41 = arith.mulf %17, %40 : vector<16x64xf32>
    %42 = vector.broadcast %31 : vector<1x64xf32> to vector<16x64xf32>
    %43 = arith.mulf %41, %42 : vector<16x64xf32>
    %44 = vector.broadcast %33 : vector<1x64xf32> to vector<16x64xf32>
    %45 = arith.addf %43, %44 : vector<16x64xf32>
    %c0_14 = arith.constant 0 : index
    %c0_15 = arith.constant 0 : index
    %46 = vector.load %arg3[%c0_14, %c0_15] : memref<64x128xf32, #tpu.memory_space<vmem>>, vector<64x128xf32>
    %c0_16 = arith.constant 0 : index
    %c0_17 = arith.constant 0 : index
    %47 = vector.load %arg4[%c0_16, %c0_17] : memref<64x128xf32, #tpu.memory_space<vmem>>, vector<64x128xf32>
    %cst_18 = arith.constant dense<0.000000e+00> : vector<16x128xf32>
    %48 = tpu.matmul %39, %46, %cst_18 {dimension_numbers = #tpu.dot_dimension_numbers<[1], [0], [0], [1], [0, 0, 1, 1], [], []>} : vector<16x64xf32>, vector<64x128xf32>, vector<16x128xf32> -> vector<16x128xf32>
    %cst_19 = arith.constant dense<0.000000e+00> : vector<16x128xf32>
    %49 = tpu.matmul %45, %47, %cst_19 {dimension_numbers = #tpu.dot_dimension_numbers<[1], [0], [0], [1], [0, 0, 1, 1], [], []>} : vector<16x64xf32>, vector<64x128xf32>, vector<16x128xf32> -> vector<16x128xf32>
    %50 = arith.addf %48, %49 : vector<16x128xf32>
    %c0_20 = arith.constant 0 : index
    %c0_21 = arith.constant 0 : index
    %51 = vector.load %arg5[%c0_20, %c0_21] : memref<16x128xf32, #tpu.memory_space<vmem>>, vector<16x128xf32>
    tpu.vector_store %arg5[%c0_20, %c0_21], %50 {strides = array<i32>} : memref<16x128xf32, #tpu.memory_space<vmem>>, vector<16x128xf32>,
    return
  }
  func.func @transform_0(%arg0: i32) -> (i32, i32, i32, i32) {
    %c0_i32 = arith.constant 0 : i32
    %c0_i32_0 = arith.constant 0 : i32
    %c0_i32_1 = arith.constant 0 : i32
    %c0_i32_2 = arith.constant 0 : i32
    return %arg0, %c0_i32, %c0_i32_0, %c0_i32_1 : i32, i32, i32, i32
  }
  func.func @transform_1(%arg0: i32) -> (i32, i32) {
    %c0_i32 = arith.constant 0 : i32
    %c0_i32_0 = arith.constant 0 : i32
    %c0_i32_1 = arith.constant 0 : i32
    return %c0_i32, %c0_i32_0 : i32, i32
  }
  func.func @transform_2(%arg0: i32) -> (i32, i32) {
    %c0_i32 = arith.constant 0 : i32
    %c0_i32_0 = arith.constant 0 : i32
    %c0_i32_1 = arith.constant 0 : i32
    return %c0_i32, %c0_i32_0 : i32, i32
  }
  func.func @transform_3(%arg0: i32) -> (i32, i32) {
    %c0_i32 = arith.constant 0 : i32
    %c0_i32_0 = arith.constant 0 : i32
    %c0_i32_1 = arith.constant 0 : i32
    return %c0_i32, %c0_i32_0 : i32, i32
  }
  func.func @transform_4(%arg0: i32) -> (i32, i32) {
    %c0_i32 = arith.constant 0 : i32
    %c0_i32_0 = arith.constant 0 : i32
    return %arg0, %c0_i32 : i32, i32
  }
}

</mosaic_0001>

<bundles_post_ra>
// kernel: patch_merging.1
= control target key start
LH: loop header
LB: loop body
LE: loop exit
PB: predicated region body
PF: predicated region fallthrough
CT: control target
= control target key end

     0   :  { %9 = vsyncpa [#allocation3], 0  ;;  %s1169_s0 = inlined_call_operand.vmem [shape: f32[8,2,4,64], index: 0, kind: input, shape index: {}]   ;;  %s1170_s1 = inlined_call_operand.vmem [shape: f32[4,64], index: 1, kind: input, shape index: {}]   ;;  %s1171_s2 = inlined_call_operand.vmem [shape: f32[64,128], index: 2, kind: input, shape index: {}]   ;;  %s1172_s3 = inlined_call_operand.vmem [shape: f32[64,128], index: 3, kind: input, shape index: {}]   ;;  %s1173_s4 = inlined_call_operand.hbm [shape: f32[32,128], index: 4, kind: output, shape index: {}]  }
   0x1   :  { %11 = vsyncpa [#allocation3 + $0x1], 0  ;;  %s943_s15 = smov 0   ;;  %s945_s16 = smov 0  }
   0x2   :  { %s947_s17 = smov 0   ;;  %s949_s18 = smov 0  }
   0x3 LB: > { %s964_s19 = sadd.s32 4294967295, %s911_s18   ;;  %s683_s20 = sadd.s32 4294967294, %s911_s18   ;;  %s911_s18 = sphi %s949_s18, %s1179_s18   ;;  %s907_s17 = sphi %s947_s17, %s1178_s17   ;;  %s903_s16 = sphi %s945_s16, %s1177_s16   ;;  %s899_s15 = sphi %s943_s15, %s1176_s15  }
   0x4   : > { %s968_s21 = sadd.s32 1, %s911_s18   ;;  %s113_s22 = sadd.s32 1, %s907_s17 }
   0x5   : > { %s110_s23 = ssub.s32 %s911_s18, %s968_s21  ;;  %p123_p0 = scmp.ne.s32.totalorder %s907_s17, %s903_s16 }
   0x6   : > { %p111_p1 = scmp.eq.s32.totalorder %s110_s23, 0  ;;  %p124_p2 = scmp.eq.s32.totalorder %s964_s19, 1 }
   0x7   : > { %p129_p3 = scmp.ne.s32.totalorder %s903_s16, %s899_s15  ;;  %p130_p4 = scmp.eq.s32.totalorder %s683_s20, 1 }
   0x8   : > { %s979_s24 = scalar_select %p111_p1, %s907_s17, %s113_s22  }
   0x9   : > { %p981_p5 = por %p124_p2, %p123_p0  ;;  %p985_p6 = por %p130_p4, %p129_p3 }
   0xa   : > { %p686_p7 = scmp.ge.s32.totalorder %s911_s18, 1  ;;  %p167_p8 = scmp.lt.s32.totalorder %s911_s18, 3 }
   0xc   : > { %p168_p9 = pnand %p686_p7, %p167_p8 }
   0xd   : > { %s688_s27 = sshll.u32 (!%p168_p9), %s964_s19, 2  ;;  %vm218_vm0 = vcmask (!%p168_p9), 523264   ;;  %v913_v16 = vmov (!%p168_p9), 839922192   ;;  %v248_v18 = vlaneseq (!%p168_p9)  ;;  %v914_v19 = vmov (!%p168_p9), 1985246804  }
   0xe   : > { %171 = sbr.rel (%p168_p9) target bundleno = 592 (0x250), region = 36  ;;  %p195_p10 = scmp.lt.s32.totalorder (!%p168_p9), %s688_s27, 7  ;;  %v246_v17 = vunpack.c.l.s4 (!%p168_p9), %v913_v16  ;;  %v253_v20 = vunpack.c.l.s4 (!%p168_p9), %v914_v19  ;;  %v427_v62 = vld [vmem:[%s1172_s3] sm:$0xff] (!%p168_p9)  ;;  %v428_v63 = vld [vmem:[%s1172_s3 + $0x8] sm:$0xff] (!%p168_p9)  ;;  %v434_v16 = vld [vmem:[%s1172_s3 + $0x38] sm:$0xff] (!%p168_p9) }
   0xf   : > { %v249_v24 = vshrl.u32 (!%p168_p9), %v248_v18, 7  ;;  %v425_v19 = vld [vmem:[%s1171_s2 + $0x30] sm:$0xff] (!%p168_p9)  ;;  %s191_s12 = sand.u32 (!%p168_p9), 1, %s903_s16   ;;  %s705_s22 = sshll.u32 (!%p168_p9), %s964_s19, 8 }
  0x10   : > { %v247_v23 = vunpack.c.0.s8 (!%p168_p9), %v246_v17  ;;  %v254_v25 = vunpack.c.0.s8 (!%p168_p9), %v253_v20  ;;  %v426_v20 = vld [vmem:[%s1171_s2 + $0x38] sm:$0xff] (!%p168_p9)  ;;  %s687_s13 = sshll.u32 (!%p168_p9), %s191_s12, 4  ;;  %s1128_s29 = scalar_lea.sflag (!%p168_p9), [#allocation3], %s191_s12 }
  0x11   : > { %s193_s14 = scalar_lea.vmem (!%p168_p9), [#allocation2], %s687_s13  ;;  %s915_s30 = smov (!%p168_p9), [#allocation2]  }
  0x12   : > { %v999_v27 = vsub.s32 (!%p168_p9), %v247_v23, %v249_v24  ;;  %v1001_v28 = vsub.s32 (!%p168_p9), %v254_v25, %v249_v24  ;;  %s621_s20 = sshll.u32 (!%p168_p9), %s193_s14, 4  ;;  %s1121_s20 = int_to_ptr.vmem [resolvable:$true] %s621_s20 }
  0x13   : > { %s849_s19 = scalar_lea.vmem (!%p168_p9), %s1121_s20, 256 }
  0x14   : > { %p850_p11 = scmp.ne.s32.totalorder (!%p168_p9), %s1121_s20, %s849_s19 }
  0x15   : > { %s1181_s27 = smov (!%p195_p10, %s688_s27), 7 }
  0x16   : > { %s704_s28 = sshll.u32 %s1181_s27, 3  ;;  %p851_p12 = pnand %p850_p11, %p981_p5 }
  0x17   : > { %s199_s5 = scalar_lea.vmem %s1169_s0, %s704_s28  ;;  %s1126_s28 = scalar_lea.hbm %s1173_s4, %s705_s22 }
  0x18   : > { %v206_v0 = vld [vmem:[%s199_s5 + $0x10] sm:$0xf]  ;;  %v208_v1 = vld [vmem:[%s199_s5 + $0x18] sm:$0xf]  ;;  %v202_v2 = vld [vmem:[%s199_s5] sm:$0xf]  ;;  %p852_p13 = pneg %p851_p12 }
  0x19   : > { %v215_v3 = vcombine.low %v206_v0, %v208_v1  ;;  %v204_v4 = vld [vmem:[%s199_s5 + $0x8] sm:$0xf]  ;;  %v207_v5 = vld [vmem:[%s199_s5 + $0x14] sm:$0xf]  ;;  %v209_v6 = vld [vmem:[%s199_s5 + $0x1c] sm:$0xf] }
  0x1a   : > { %v214_v7 = vcombine.low %v202_v2, %v204_v4  ;;  %v230_v8 = vcombine.low %v207_v5, %v209_v6  ;;  %v203_v9 = vld [vmem:[%s199_s5 + $0x4] sm:$0xf]  ;;  %v205_v10 = vld [vmem:[%s199_s5 + $0xc] sm:$0xf]  ;;  %s853_s5 = sshll.u32 %s915_s30, 4  ;;  %s854_s5 = int_to_ptr.vmem [resolvable:$false] %s853_s5 }
  0x1b   : > { %v222_v11 = vsel %vm218_vm0, %v215_v3, 0.0  ;;  %v229_v12 = vcombine.low %v203_v9, %v205_v10  ;;  %s855_s6 = scalar_lea.vmem %s854_s5, 512  ;;  %p856_p0 = scmp.lt.s32.totalorder %s1121_s20, %s854_s5 }
  0x1c   : > { %223 = vadd.xlane.f32.xlu1 %v222_v11  ;;  %v219_v13 = vsel %vm218_vm0, %v214_v7, 0.0  ;;  %v236_v14 = vsel %vm218_vm0, %v230_v8, 0.0  ;;  %v422_v8 = vld [vmem:[%s1171_s2 + $0x18] sm:$0xff]  ;;  %v432_v11 = vld [vmem:[%s1172_s3 + $0x28] sm:$0xff]  ;;  %p857_p1 = scmp.lt.s32.totalorder %s855_s6, %s849_s19 }
  0x1d   : > { %220 = vadd.xlane.f32.xlu0 %v219_v13  ;;  %v233_v15 = vsel %vm218_vm0, %v229_v12, 0.0  ;;  %v423_v12 = vld [vmem:[%s1171_s2 + $0x20] sm:$0xff] }
  0x1e   : > { %p858_p2 = por %p857_p1, %p856_p0 }
  0x20   : > { %237 = vadd.xlane.f32.xlu1 %v236_v14  ;;  %v424_v14 = vld [vmem:[%s1171_s2 + $0x28] sm:$0xff]  ;;  %p859_p3 = pnand %p858_p2, %p852_p13 }
  0x21   : > { %234 = vadd.xlane.f32.xlu0 %v233_v15  ;;  %v433_v15 = vld [vmem:[%s1172_s3 + $0x30] sm:$0xff]  ;;  %v788_v17 = vpack.c.bf16 %v424_v14, %v423_v12 }
  0x22   : > { %v776_v18 = vpack.c.bf16 %v434_v16, %v433_v15 }
  0xa9   : > { %v224_v21 = vpop.xlane.xlu1 %223 }
  0xaa   : > { %v221_v22 = vpop.xlane.xlu0 %220 }
  0xad   : > { %v238_v26 = vpop.xlane.xlu1 %237 }
  0xae   : > { %v240_v29 = vadd.f32 %v238_v26, %v224_v21  ;;  %v235_v30 = vpop.xlane.xlu0 %234  ;;  %v792_v21 = vpack.c.bf16 %v426_v20, %v425_v19 }
  0xaf   : > { %v239_v31 = vadd.f32 %v235_v30, %v221_v22 }
  0xb0   : > { %v242_v32 = vmul.f32 0.0078125, %v240_v29 }
  0xb1   : > { %v241_v33 = vmul.f32 0.0078125, %v239_v31 }
  0xb2   : > { %v265_v34 = vrot.slane %v242_v32, %v999_v27  ;;  %v272_v35 = vrot.slane %v242_v32, %v1001_v28 }
  0xb3   : > { %v251_v36 = vrot.slane %v241_v33, %v999_v27  ;;  %v258_v37 = vrot.slane %v241_v33, %v1001_v28 }
  0xb4   : > { %v1007_v38 = vsub.f32 %v206_v0, %v265_v34  ;;  %v1009_v39 = vsub.f32 %v208_v1, %v272_v35  ;;  %v1011_v40 = vsub.f32 %v207_v5, %v265_v34  ;;  %v1013_v41 = vsub.f32 %v209_v6, %v272_v35  ;;  %v419_v0 = vld [vmem:[%s1171_s2] sm:$0xff]  ;;  %v430_v5 = vld [vmem:[%s1172_s3 + $0x18] sm:$0xff]  ;;  %v421_v6 = vld [vmem:[%s1171_s2 + $0x10] sm:$0xff] }
  0xb5   : > { %v1015_v42 = vsub.f32 %v202_v2, %v251_v36  ;;  %v1017_v43 = vsub.f32 %v204_v4, %v258_v37  ;;  %v1019_v44 = vsub.f32 %v203_v9, %v251_v36  ;;  %v1021_v45 = vsub.f32 %v205_v10, %v258_v37  ;;  %v420_v2 = vld [vmem:[%s1171_s2 + $0x8] sm:$0xff]  ;;  %v429_v4 = vld [vmem:[%s1172_s3 + $0x10] sm:$0xff]  ;;  %v431_v10 = vld [vmem:[%s1172_s3 + $0x20] sm:$0xff] }
  0xb6   : > { %v305_v46 = vmul.f32 %v1011_v40, %v1011_v40  ;;  %v306_v47 = vmul.f32 %v1013_v41, %v1013_v41  ;;  %v287_v48 = vmul.f32 %v1007_v38, %v1007_v38  ;;  %v288_v49 = vmul.f32 %v1009_v39, %v1009_v39  ;;  %v693_v34 = vld [vmem:[%s1170_s1 + $0x1] ss:$0 sm:$0xff]  ;;  %v694_v35 = vld [vmem:[%s1170_s1 + $0x3] ss:$0 sm:$0xff]  ;;  %v691_v36 = vld [vmem:[%s1170_s1] ss:$0 sm:$0xff] }
  0xb7   : > { %v303_v50 = vmul.f32 %v1019_v44, %v1019_v44  ;;  %v304_v51 = vmul.f32 %v1021_v45, %v1021_v45  ;;  %v285_v52 = vmul.f32 %v1015_v42, %v1015_v42  ;;  %v286_v53 = vmul.f32 %v1017_v43, %v1017_v43 }
  0xb8   : > { %v312_v58 = vcombine.low %v305_v46, %v306_v47  ;;  %v294_v59 = vcombine.low %v287_v48, %v288_v49  ;;  %v764_v1 = vpack.c.bf16 %v428_v63, %v427_v62  ;;  %v780_v3 = vpack.c.bf16 %v420_v2, %v419_v0  ;;  %v692_v49 = vld [vmem:[%s1170_s1 + $0x2] ss:$0 sm:$0xff] }
  0xb9   : > { %v311_v54 = vcombine.low %v303_v50, %v304_v51  ;;  %v293_v55 = vcombine.low %v285_v52, %v286_v53  ;;  %v768_v7 = vpack.c.bf16 %v430_v5, %v429_v4  ;;  %v784_v9 = vpack.c.bf16 %v422_v8, %v421_v6 }
  0xba   : > { %v318_v60 = vsel %vm218_vm0, %v312_v58, 0.0  ;;  %v300_v61 = vsel %vm218_vm0, %v294_v59, 0.0  ;;  %765 = vmatprep.subr.bf16.mxu1 %v764_v1  ;;  %781 = vmatprep.subr.bf16.mxu0 %v780_v3  ;;  %v772_v13 = vpack.c.bf16 %v432_v11, %v431_v10  ;;  %v402_v48 = vcombine.high %v693_v34, %v693_v34 }
  0xbb   : > { %v315_v56 = vsel %vm218_vm0, %v311_v54, 0.0  ;;  %v297_v57 = vsel %vm218_vm0, %v293_v55, 0.0  ;;  %767 = vmatpush3.bf16.msra.mxu1 %v764_v1  ;;  %783 = vmatpush3.bf16.msra.mxu0 %v780_v3  ;;  %v413_v50 = vcombine.high %v694_v35, %v694_v35  ;;  %v376_v51 = vcombine.high %v691_v36, %v691_v36 }
  0xbc   : > { %316 = vadd.xlane.f32.xlu1 %v315_v56  ;;  %298 = vadd.xlane.f32.xlu0 %v297_v57  ;;  %v387_v57 = vcombine.high %v692_v49, %v692_v49 }
  0xbd   : > { %769 = vmatprep.subr.bf16.mxu1 %v768_v7  ;;  %785 = vmatprep.subr.bf16.mxu0 %v784_v9 }
  0xbf   : > { %771 = vmatpush3.bf16.msra.mxu1 %v768_v7  ;;  %787 = vmatpush3.bf16.msra.mxu0 %v784_v9 }
  0xc0   : > { %319 = vadd.xlane.f32.xlu1 %v318_v60  ;;  %301 = vadd.xlane.f32.xlu0 %v300_v61 }
  0xc1   : > { %773 = vmatprep.subr.bf16.mxu1 %v772_v13  ;;  %789 = vmatprep.subr.bf16.mxu0 %v788_v17 }
  0xc3   : > { %775 = vmatpush3.bf16.msra.mxu1 %v772_v13  ;;  %791 = vmatpush3.bf16.msra.mxu0 %v788_v17 }
  0xc4   : > { %777 = vmatprep.subr.bf16.mxu1 %v776_v18  ;;  %793 = vmatprep.subr.bf16.mxu0 %v792_v21 }
  0xc7   : > { %779 = vmatpush3.bf16.msra.mxu1 %v776_v18  ;;  %795 = vmatpush3.bf16.msra.mxu0 %v792_v21 }
 0x149   : > { %v317_v22 = vpop.xlane.xlu1 %316  ;;  %v299_v23 = vpop.xlane.xlu0 %298 }
 0x14a   : > { %v321_v24 = vadd.f32 %v317_v22, %v299_v23 }
 0x14c   : > { %v323_v25 = vmul.f32 0.0078125, %v321_v24 }
 0x14d   : > { %v320_v26 = vpop.xlane.xlu1 %319  ;;  %v302_v29 = vpop.xlane.xlu0 %301 }
 0x14e   : > { %v325_v30 = vadd.f32 1e-05, %v323_v25  ;;  %v322_v31 = vadd.f32 %v320_v26, %v302_v29 }
 0x150   : > { %845 = vrsqrt.f32 %v325_v30  ;;  %v324_v32 = vmul.f32 0.0078125, %v322_v31 }
 0x152   : > { %v326_v33 = vadd.f32 1e-05, %v324_v32 }
 0x154   : > { %847 = vrsqrt.f32 %v326_v33 }
 0x15a   : > { %v846_v37 = vpop.eup %845 }
 0x15b   : > { %v341_v46 = vrot.slane %v846_v37, %v999_v27  ;;  %v348_v47 = vrot.slane %v846_v37, %v1001_v28 }
 0x15d   : > { %v393_v52 = vmul.f32 %v341_v46, %v1019_v44  ;;  %v394_v53 = vmul.f32 %v348_v47, %v1021_v45  ;;  %v367_v54 = vmul.f32 %v341_v46, %v1015_v42  ;;  %v368_v55 = vmul.f32 %v348_v47, %v1017_v43 }
 0x15e   : > { %v848_v56 = vpop.eup %847 }
 0x15f   : > { %v355_v58 = vrot.slane %v848_v56, %v999_v27  ;;  %v362_v59 = vrot.slane %v848_v56, %v1001_v28  ;;  %v404_v60 = vmul.f32 %v693_v34, %v393_v52  ;;  %v405_v61 = vmul.f32 %v402_v48, %v394_v53 }
 0x160   : > { %v378_v62 = vmul.f32 %v691_v36, %v367_v54  ;;  %v379_v63 = vmul.f32 %v376_v51, %v368_v55 }
 0x161   : > { %v395_v0 = vmul.f32 %v355_v58, %v1011_v40  ;;  %v396_v44 = vmul.f32 %v362_v59, %v1013_v41  ;;  %v415_v1 = vadd.f32 %v694_v35, %v404_v60  ;;  %v416_v45 = vadd.f32 %v413_v50, %v405_v61 }
 0x162   : > { %v369_v42 = vmul.f32 %v355_v58, %v1007_v38  ;;  %v370_v43 = vmul.f32 %v362_v59, %v1009_v39  ;;  %v389_v2 = vadd.f32 %v692_v49, %v378_v62  ;;  %v390_v3 = vadd.f32 %v387_v57, %v379_v63 }
 0x163   : > { %v406_v4 = vmul.f32 %v693_v34, %v395_v0  ;;  %v407_v27 = vmul.f32 %v402_v48, %v396_v44  ;;  %v439_v28 = vcombine.low %v415_v1, %v416_v45 }
 0x164   : > { %v380_v5 = vmul.f32 %v691_v36, %v369_v42  ;;  %v381_v6 = vmul.f32 %v376_v51, %v370_v43  ;;  %v524_v7 = vcombine.low %v389_v2, %v390_v3 }
 0x165   : > { %v417_v8 = vadd.f32 %v694_v35, %v406_v4  ;;  %v418_v40 = vadd.f32 %v413_v50, %v407_v27  ;;  %742 = vmatprep.mubr.msk.f32.mxu1 %vm218_vm0, %v439_v28 }
 0x166   : > { %v391_v41 = vadd.f32 %v692_v49, %v380_v5  ;;  %v392_v9 = vadd.f32 %v387_v57, %v381_v6  ;;  %761 = vmatprep.mubr.msk.f32.mxu0 %vm218_vm0, %v524_v7 }
 0x167   : > { %v440_v38 = vcombine.low %v417_v8, %v418_v40 }
 0x168   : > { %v525_v39 = vcombine.low %v391_v41, %v392_v9 }
 0x169   : > { %743 = vmatmul.mubr.msk.f32.vlgmr.msra.gmra.mrb[0].mxu1 %vm218_vm0, %v440_v38 }
 0x16a   : > { %762 = vmatmul.mubr.msk.f32.vlgmr.msra.gmra.mrb[0].mxu0 %vm218_vm0, %v525_v39 }
 0x23c   : > { %v744_v10 = vpop.f32.mrb[0].mxu1 }
 0x23d   : > { %v763_v11 = vpop.f32.mrb[0].mxu0  ;;  %v511_v12 = vpop.f32.mrb[1].mxu1 }
 0x23e   : > { %v602_v13 = vadd.f32 %v763_v11, %v744_v10  ;;  %v596_v14 = vpop.f32.mrb[1].mxu0 }
 0x23f   : > { %v597_v15 = vadd.f32 %v596_v14, %v511_v12 }
 0x240   : > { %606 = vst [vmem:[%s193_s14 + $0x8] sm:$0xff] %v602_v13 }
 0x241   : > { %605 = vst [vmem:[%s193_s14] sm:$0xff] %v597_v15 }
 0x242   : > { %862 = shalt.err (!%p859_p3)
}
 0x243   : > { %s863_s7 = scalar_lea.hbm %s1126_s28, 256  ;;  %s867_s10 = scalar_lea.hbm %s1173_s4, 512 }
 0x244   : > { %p864_p4 = scmp.ne.s32.totalorder %s1126_s28, %s863_s7  ;;  %p868_p9 = scmp.lt.u32.totalorder %s1126_s28, %s1173_s4 }
 0x245   : > { %p869_p10 = scmp.lt.u32.totalorder %s867_s10, %s863_s7  ;;  %p871_p12 = scmp.lt.u32.totalorder %s863_s7, %s1126_s28 }
 0x246   : > { %p865_p7 = pnand %p864_p4, %p981_p5 }
 0x247   : > { %p870_p11 = por %p869_p10, %p868_p9 }
 0x248   : > { %p866_p8 = pneg %p865_p7 }
 0x249   : > { %p872_p13 = por %p871_p12, %p870_p11 }
 0x24b   : > { %p873_p0 = pnand %p872_p13, %p866_p8 }
 0x24d   : > { %876 = shalt.err (!%p873_p0)
}
 0x24e   : > { %s916_s13 = smov 128   ;;  %s917_s14 = smov 8  }
 0x24f   : > { %798 = dma.vmem_to_hbm [thread:$0]  (%p981_p5), %s1121_s20, 256, %s1126_s28, %s1128_s29, %s916_s13, %s916_s13, %s917_s14  }
 0x250 PF: > { %p804_p1 = scmp.ge.s32.totalorder %s911_s18, 2  ;;  %s636_s22 = sand.u32 1, %s899_s15  }
 0x251   : > { %s637_s23 = scalar_lea.sflag [#allocation3], %s636_s22 }
 0x252   : > { %p801_p2 = pnand %p804_p1, %p985_p6 }
 0x254   : > { %894 = dma.done.wait (!%p801_p2), %s637_s23, 256  }
 0x255   : > { %896 = vsyncadd (!%p801_p2), %s637_s23, 4294967040  ;;  %p14_p3 = scmp.ge.s32.totalorder %s968_s21, 4   ;;  %s1176_s15 = smov %s903_s16 }
 0x256   : > { %s1177_s16 = smov %s907_s17  ;;  %s1178_s17 = smov %s979_s24 }
 0x257   : > { %s1179_s18 = smov %s968_s21  ;;  %16 = sbr.rel (!%p14_p3) target bundleno = 3 (0x3), region = 71 }
 0x25e   :  { %642 = vsyncpa [#allocation3], 1 }
 0x25f   :  { %644 = vsyncpa [#allocation3 + $0x1], 1 }

</bundles_post_ra>
